<compile_context>
chip_gen: v6e
topology: v6e:2x2x1
jax: 0.10.0
libtpu: 0.0.40
codegen_flags: <defaults>
</compile_context>

<pallas_src>
import jax
import jax.numpy as jnp
from jax.experimental import pallas as pl
from jax.experimental.pallas import tpu as pltpu

LANES = 128            # samples per packed row (lane width)
PAIR = 2 * LANES       # interleaved (feature0, feature1) values per packed row


def logistic_kernel(x_ref, w_ref, b_ref, o_ref):
    # x_ref : (TILE_R, 256) f32 VMEM — row r holds 128 samples as [f0,f1,f0,f1,...]
    # w_ref : (256, 128)    f32 VMEM — structured de-interleave weights; constant
    #                                  index_map => DMA'd once, resident all grid steps
    # b_ref : (1,)          f32 SMEM — bias scalar
    # o_ref : (TILE_R, 128) f32 VMEM — sigmoid outputs, sublane/lane dense
    z = jnp.dot(x_ref[...], w_ref[...], preferred_element_type=jnp.float32)  # MXU
    z = z + b_ref[0]
    t = jnp.exp(-z)                                      # EUP transcendental
    # Exact reciprocal (kernel is HBM-bound, so this costs nothing visible);
    # switch to approx=True (EUP vrcp, ~1e-3) if that accuracy is acceptable.
    o_ref[...] = pl.reciprocal(1.0 + t, approx=False)


def logistic_forward(x, w, b, *, tile_r=2048):
    """sigmoid(x @ w.T + b) for x:(N,2), w:(1,2), b:(1,).  Returns (N,1) f32.

    tile_r = packed rows (128 samples each) per grid step.  2048 rows = 2 MiB
    of input / 1 MiB of output per step (>= the 1-4 MiB roofline target) and,
    double-buffered, stays far under v7x's 64 MiB VMEM.
    """
    N, IN = x.shape
    OUT = w.shape[0]
    assert IN == 2 and OUT == 1, "LogisticClass is Linear(2, 1)"
    assert 8 <= tile_r <= 8192 and tile_r % 8 == 0  # sublane-aligned, v7x VMEM cap

    n_rows = pl.cdiv(N, LANES)          # packed rows of 128 samples
    n_full = n_rows * LANES             # samples after 128-alignment

    x32 = jnp.asarray(x, jnp.float32)
    if n_full != N:
        # Only a ragged tail (< 128 samples) forces this pad copy; when
        # N % 128 == 0 the kernel consumes x in place (reshape below is free).
        x32 = jnp.pad(x32, ((0, n_full - N), (0, 0)))
    x_packed = x32.reshape(n_rows, PAIR)          # contiguous -> no data movement

    # Structured de-interleave weight: W[2k, k] = w0, W[2k+1, k] = w1, so
    # (x_packed @ W)[r, j] = w0 * x[128r+j, 0] + w1 * x[128r+j, 1].
    # 128 KiB, built once per call, resident in VMEM for the whole grid.
    w32 = jnp.asarray(w, jnp.float32).reshape(2)
    eye = jnp.eye(LANES, dtype=jnp.float32)
    w_struct = (eye[:, None, :] * w32[None, :, None]).reshape(PAIR, LANES)
    b32 = jnp.asarray(b, jnp.float32).reshape(1)

    # Row tiling: multiple of 8 sublanes; at least 2 grid steps when there is
    # enough work so both TensorCores get used on v7x (harmless on v5e/v6e).
    if n_rows <= 8:
        tile_rows = n_rows                               # full extent (always legal)
    else:
        half = pl.cdiv(n_rows, 2)
        tile_rows = max(8, min(tile_r, ((half + 7) // 8) * 8))
    grid = (pl.cdiv(n_rows, tile_rows),)                 # partial last block is fine

    # VMEM budget from the actual blocks (x + out double-buffered, + W + slack).
    block_bytes = 4 * (tile_rows * PAIR + tile_rows * LANES + PAIR * LANES)
    vmem_limit = int(min(48 * 1024 * 1024, max(8 * 1024 * 1024, 4 * block_bytes)))

    out_packed = pl.pallas_call(
        logistic_kernel,
        out_shape=jax.ShapeDtypeStruct((n_rows, LANES), jnp.float32),
        grid_spec=pltpu.PrefetchScalarGridSpec(
            num_scalar_prefetch=0,
            grid=grid,
            in_specs=[
                # x tiles: (TILE_R, 256) — lane dim 256 (multiple of 128),
                # sublane dim multiple of 8 -> fully dense vregs.
                pl.BlockSpec((tile_rows, PAIR), lambda i: (i, 0)),
                # Structured weight: same block every step -> fetched once.
                pl.BlockSpec((PAIR, LANES), lambda i: (0, 0)),
                # Bias scalar resident in SMEM.
                pl.BlockSpec(memory_space=pltpu.MemorySpace.SMEM),
            ],
            out_specs=pl.BlockSpec((tile_rows, LANES), lambda i: (i, 0)),
        ),
        compiler_params=pltpu.CompilerParams(
            dimension_semantics=("parallel",),
            vmem_limit_bytes=vmem_limit,
        ),
    )(x_packed, w_struct, b32)

    # (n_rows, 128) -> (N, 1); reshape is free, the slice only copies when ragged.
    return out_packed.reshape(n_rows * LANES, 1)[:N]


if __name__ == "__main__":
    key = jax.random.PRNGKey(0)
    k_x, k_w, k_b = jax.random.split(key, 3)

    IN, OUT = 2, 1
    bound = 1.0 / (IN ** 0.5)           # nn.Linear default init range
    w = jax.random.uniform(k_w, (OUT, IN), jnp.float32, -bound, bound)
    b = jax.random.uniform(k_b, (OUT,), jnp.float32, -bound, bound)

    # (N, tile_r): 4096 -> clean path (no pad, 2 grid steps);
    #              1200 -> ragged path (pad to 1280, partial last row-block).
    for n, tile_r in ((4096, 16), (1200, 16)):
        x = jax.random.normal(jax.random.fold_in(k_x, n), (n, IN), jnp.float32)
        out = logistic_forward(x, w, b, tile_r=tile_r)
        jax.block_until_ready(out)

        # Pure elementwise f32 reference (no XLA dot involved).
        ref = jax.nn.sigmoid(x[:, 0:1] * w[0, 0] + x[:, 1:2] * w[0, 1] + b[0])
        assert out.shape == (n, OUT)
        err = float(jnp.max(jnp.abs(out - ref)))
        # The f32 MXU path is multi-pass (error ~1e-7 here); the tolerance only
        # leaves margin for a reduced-precision pass, while any layout /
        # de-interleave bug would produce O(0.1-1) errors.
        assert err < 2.5e-3, f"N={n}: max|out-ref|={err}"

    print("KERNEL_OK")
</pallas_src>

<mosaic_0001>
module attributes {stable_mosaic.version = 11 : i64} {
  func.func @logistic_kernel(%arg0: i32, %arg1: memref<16x256xf32, #tpu.memory_space<vmem>>, %arg2: memref<256x128xf32, #tpu.memory_space<vmem>>, %arg3: memref<1xf32, #tpu.memory_space<smem>>, %arg4: memref<16x128xf32, #tpu.memory_space<vmem>>) attributes {dimension_semantics = [#tpu.dimension_semantics<parallel>], iteration_bounds = array<i64: 2>, scalar_prefetch = 0 : i64, scratch_operands = 0 : i64, tpu.core_type = #tpu.core_type<tc>, window_params = [{transform_indices = @transform_0, window_bounds = array<i64: 16, 256>}, {pipeline_mode = #tpu.pipeline_mode<synchronous>, transform_indices = @transform_1, window_bounds = array<i64: 256, 128>}, {transform_indices = @transform_2, window_bounds = array<i64: 1>}, {transform_indices = @transform_3, window_bounds = array<i64: 16, 128>}]} {
    %c0 = arith.constant 0 : index
    %c0_0 = arith.constant 0 : index
    %0 = vector.load %arg1[%c0, %c0_0] : memref<16x256xf32, #tpu.memory_space<vmem>>, vector<16x256xf32>
    %c0_1 = arith.constant 0 : index
    %c0_2 = arith.constant 0 : index
    %1 = vector.load %arg2[%c0_1, %c0_2] : memref<256x128xf32, #tpu.memory_space<vmem>>, vector<256x128xf32>
    %cst = arith.constant dense<0.000000e+00> : vector<16x128xf32>
    %2 = tpu.matmul %0, %1, %cst {dimension_numbers = #tpu.dot_dimension_numbers<[1], [0], [0], [1], [0, 0, 1, 1], [], []>} : vector<16x256xf32>, vector<256x128xf32>, vector<16x128xf32> -> vector<16x128xf32>
    %c0_3 = arith.constant 0 : index
    %3 = memref.load %arg3[%c0_3] : memref<1xf32, #tpu.memory_space<smem>>
    %4 = vector.broadcast %3 : f32 to vector<16x128xf32>
    %5 = arith.addf %2, %4 : vector<16x128xf32>
    %cst_4 = arith.constant 0.000000e+00 : f32
    %6 = vector.broadcast %cst_4 : f32 to vector<16x128xf32>
    %7 = arith.subf %6, %5 : vector<16x128xf32>
    %8 = math.exp %7 : vector<16x128xf32>
    %cst_5 = arith.constant 1.000000e+00 : f32
    %9 = vector.broadcast %cst_5 : f32 to vector<16x128xf32>
    %10 = arith.addf %9, %8 : vector<16x128xf32>
    %11 = tpu.reciprocal %10 : vector<16x128xf32> -> vector<16x128xf32>
    %c0_6 = arith.constant 0 : index
    %c0_7 = arith.constant 0 : index
    %12 = vector.load %arg4[%c0_6, %c0_7] : memref<16x128xf32, #tpu.memory_space<vmem>>, vector<16x128xf32>
    tpu.vector_store %arg4[%c0_6, %c0_7], %11 {strides = array<i32>} : memref<16x128xf32, #tpu.memory_space<vmem>>, vector<16x128xf32>,
    return
  }
  func.func @transform_0(%arg0: i32) -> (i32, i32) {
    %c0_i32 = arith.constant 0 : i32
    %c0_i32_0 = arith.constant 0 : i32
    return %arg0, %c0_i32 : i32, i32
  }
  func.func @transform_1(%arg0: i32) -> (i32, i32) {
    %c0_i32 = arith.constant 0 : i32
    %c0_i32_0 = arith.constant 0 : i32
    %c0_i32_1 = arith.constant 0 : i32
    return %c0_i32, %c0_i32_0 : i32, i32
  }
  func.func @transform_2(%arg0: i32) -> i32 {
    %c0_i32 = arith.constant 0 : i32
    %c0_i32_0 = arith.constant 0 : i32
    return %c0_i32 : i32
  }
  func.func @transform_3(%arg0: i32) -> (i32, i32) {
    %c0_i32 = arith.constant 0 : i32
    %c0_i32_0 = arith.constant 0 : i32
    return %arg0, %c0_i32 : i32, i32
  }
}

</mosaic_0001>

<bundles_post_ra>
// kernel: tpu_custom_call.1
= control target key start
LH: loop header
LB: loop body
LE: loop exit
PB: predicated region body
PF: predicated region fallthrough
CT: control target
= control target key end

     0   :  { %s931_s0 = inlined_call_operand.hbm [shape: f32[32,256], index: 0, kind: input, shape index: {}]   ;;  %s932_s1 = inlined_call_operand.hbm [shape: f32[256,128], index: 1, kind: input, shape index: {}]   ;;  %s933_s2 = inlined_call_operand.<no memory space> [shape: f32[1], index: 2, kind: input, shape index: {}]   ;;  %s934_s3 = inlined_call_operand.hbm [shape: f32[32,128], index: 3, kind: output, shape index: {}]  }
   0x1   :  { %8 = sst [smem:[#allocation2]] %s933_s2 }
   0x2   :  { %9 = vsyncpa [#allocation4], 0 }
   0x3   :  { %11 = vsyncpa [#allocation4 + $0x1], 0 }
   0x4   :  { %12 = vsyncpa [#allocation7], 0 }
   0x5   :  { %13 = vsyncpa [#allocation5], 0 }
   0x6   :  { %15 = vsyncpa [#allocation5 + $0x1], 0  ;;  %s747_s14 = smov 0   ;;  %s749_s15 = smov 0  }
   0x7   :  { %s751_s16 = smov 0   ;;  %s753_s17 = smov 0  }
   0x8 LB: > { %s768_s2 = sadd.s32 4294967295, %s713_s17   ;;  %s430_s18 = sadd.s32 4294967294, %s713_s17   ;;  %s713_s17 = sphi %s753_s17, %s956_s17   ;;  %s709_s16 = sphi %s751_s16, %s955_s16   ;;  %s705_s15 = sphi %s749_s15, %s954_s15   ;;  %s701_s14 = sphi %s747_s14, %s953_s14  }
   0x9   : > { %p41_p0 = scmp.ne.s32.totalorder %s705_s15, %s701_s14  ;;  %p935_p1 = scmp.eq.s32.totalorder %s768_s2, 0 }
   0xa   : > { %p113_p3 = scmp.eq.s32.totalorder %s430_s18, 1  ;;  %p431_p5 = scmp.ge.s32.totalorder %s713_s17, 1 }
   0xb   : > { %p777_p4 = por %p935_p1, %p41_p0  ;;  %p120_p7 = scmp.lt.s32.totalorder %s713_s17, 3 }
   0xc   : > { %p782_p6 = por %p113_p3, %p41_p0  ;;  %s715_s22 = smov [#allocation6]  }
   0xd   : > { %s939_s19 = scalar_select %p777_p4, 1, 0 }
   0xe   : > { %s940_s20 = scalar_select %p782_p6, 1, 0 }
   0xf   : > { %p787_p8 = pnand %p431_p5, %p120_p7  ;;  %s132_s23 = sshll.u32 %s715_s22, 4  ;;  %s133_s23 = int_to_ptr.vmem [resolvable:$true] %s132_s23 }
  0x10   : > { %s801_s25 = sadd.s32 1, %s713_s17   ;;  %s28_s26 = sadd.s32 1, %s709_s16 }
  0x11   : > { %s941_s21 = scalar_select %p787_p8, 1, 0 }
  0x12   : > { %p528_p9 = pneg %p787_p8  ;;  %s25_s27 = ssub.s32 %s713_s17, %s801_s25 }
  0x13   : > { %s602_s28 = scalar_lea.vmem %s133_s23, 4096  ;;  %p610_p5 = scmp.lt.s32.totalorder %s133_s23, %s133_s23 }
  0x14   : > { %p796_p11 = pnand %p528_p9, %p935_p1  ;;  %p603_p13 = scmp.ne.s32.totalorder %s133_s23, %s602_s28 }
  0x15   : > { %p611_p7 = scmp.lt.s32.totalorder %s602_s28, %s602_s28 }
  0x16   : > { %p593_p12 = pneg %p796_p11 }
  0x17   : > { %p612_p10 = por %p611_p7, %p610_p5 }
  0x18   : > { %p605_p0 = pnand %p603_p13, %p593_p12 }
  0x1a   : > { %p606_p3 = pneg %p605_p0 }
  0x1c   : > { %p613_p2 = pnand %p612_p10, %p606_p3 }
  0x1e   : > { %616 = shalt.err (!%p613_p2)
}
  0x1f   : > { %s716_s29 = smov 128   ;;  %s717_s30 = smov 8  }
  0x20   : > { %531 = dma.hbm_to_vmem [thread:$0]  (!%p796_p11), %s932_s1, 4096, %s133_s23, [#allocation7], %s716_s29, %s716_s29, %s717_s30  }
  0x21   : > { %p26_p9 = scmp.eq.s32.totalorder %s25_s27, 0  ;;  %p35_p12 = scmp.ne.s32.totalorder %s709_s16, %s705_s15 }
  0x22   : > { %p36_p10 = scmp.eq.s32.totalorder %s713_s17, 0  ;;  %p541_p2 = scmp.lt.s32.totalorder %s713_s17, 2 }
  0x23   : > { %s818_s6 = scalar_select %p26_p9, %s709_s16, %s28_s26  }
  0x24   : > { %p37_p13 = por %p36_p10, %p35_p12  ;;  %p943_p0 = scmp.eq.s32.totalorder %s768_s2, 1 }
  0x25   : > { %s149_s8 = sand.u32 1, %s709_s16   ;;  %s448_s9 = sshll.u32 %s713_s17, 9 }
  0x26   : > { %p822_p3 = por %p943_p0, %p35_p12  ;;  %s434_s10 = sshll.u32 %s149_s8, 5 }
  0x27   : > { %s831_s13 = scalar_lea.hbm %s931_s0, %s448_s9  ;;  %s153_s18 = scalar_lea.vmem [#allocation3], %s434_s10 }
  0x28   : > { %s944_s7 = scalar_select %p822_p3, 1, 0 }
  0x29   : > { %s161_s22 = sshll.u32 %s153_s18, 4  ;;  %p833_p11 = pnand %p541_p2, %p37_p13  ;;  %s837_s22 = int_to_ptr.vmem [resolvable:$true] %s161_s22 }
  0x2a   : > { %s839_s24 = scalar_lea.sflag [#allocation4], %s149_s8  ;;  %s617_s26 = scalar_lea.hbm %s831_s13, 512 }
  0x2b   : > { %p618_p5 = scmp.ne.s32.totalorder %s831_s13, %s617_s26  ;;  %p619_p7 = pneg %p833_p11 }
  0x2c   : > { %s622_s29 = scalar_lea.hbm %s931_s0, 1024  ;;  %p623_p10 = scmp.lt.s32.totalorder %s831_s13, %s931_s0 }
  0x2d   : > { %p620_p9 = pnand %p619_p7, %p618_p5  ;;  %p624_p2 = scmp.lt.s32.totalorder %s622_s29, %s617_s26 }
  0x2f   : > { %p621_p12 = pneg %p620_p9  ;;  %p625_p13 = por %p624_p2, %p623_p10 }
  0x31   : > { %p626_p0 = pnand %p625_p13, %p621_p12 }
  0x33   : > { %629 = shalt.err (!%p626_p0)
}
  0x34   : > { %s630_s5 = scalar_lea.vmem %s837_s22, 512  ;;  %s718_s8 = smov [#allocation3]  }
  0x35   : > { %p631_p1 = scmp.ne.s32.totalorder %s837_s22, %s630_s5  ;;  %s635_s9 = sshll.u32 %s718_s8, 4  ;;  %s636_s9 = int_to_ptr.vmem [resolvable:$false] %s635_s9 }
  0x36   : > { %s637_s10 = scalar_lea.vmem %s636_s9, 1024  ;;  %p638_p9 = scmp.lt.s32.totalorder %s837_s22, %s636_s9 }
  0x37   : > { %p633_p6 = pnand %p631_p1, %p619_p7  ;;  %p639_p3 = scmp.lt.s32.totalorder %s637_s10, %s630_s5 }
  0x39   : > { %p634_p5 = pneg %p633_p6  ;;  %p640_p4 = por %p639_p3, %p638_p9 }
  0x3b   : > { %p641_p8 = pnand %p640_p4, %p634_p5 }
  0x3d   : > { %644 = shalt.err (!%p641_p8)
}
  0x3e   : > { %s719_s11 = smov 256   ;;  %s720_s12 = smov 16  }
  0x3f   : > { %535 = dma.hbm_to_vmem [thread:$0]  (!%p833_p11), %s831_s13, 512, %s837_s22, %s839_s24, %s719_s11, %s719_s11, %s720_s12  }
  0x40   : > { %p946_p1 = scmp.ne.s32.totalorder %s941_s21, 0 }
  0x41   : > { %s863_s18 = sand.u32 (!%p946_p1), 1, %s705_s15   ;;  %p947_p4 = scmp.ne.s32.totalorder (!%p946_p1), %s939_s19, 0 }
  0x42   : > { %173 = sbr.rel (%p946_p1) target bundleno = 357 (0x165), region = 32  ;;  %s439_s26 = sshll.u32 (!%p946_p1), %s863_s18, 5 }
  0x43   : > { %s176_s27 = scalar_lea.sflag (!%p946_p1), [#allocation4], %s863_s18  ;;  %s867_s28 = scalar_lea.vmem (!%p946_p1), [#allocation3], %s439_s26 }
  0x47   : > { %688 = dma.done.wait (%p947_p4), %s176_s27, 512  }
  0x48   : > { %690 = vsyncadd (%p947_p4), %s176_s27, 4294966784  ;;  %p948_p6 = scmp.eq.s32.totalorder %s768_s2, 0 }
  0x4a   : > { %692 = dma.done.wait (%p948_p6), [#allocation7], 4096   ;;  %p949_p8 = pmov %p948_p6 }
  0x4b   : > { %v243_v0 = vld [vmem:[#allocation6 + $0xf8] sm:$0xff]  ;;  %v242_v2 = vld [vmem:[#allocation6 + $0xf0] sm:$0xff]  ;;  %v241_v4 = vld [vmem:[#allocation6 + $0xe8] sm:$0xff]  ;;  %s244_s19 = sld [smem:[#allocation2]]  ;;  %s441_s21 = sshll.u32 %s863_s18, 4 }
  0x4c   : > { %694 = vsyncadd (%p949_p8), [#allocation7], 4294963200  ;;  %v227_v1 = vld [vmem:[#allocation6 + $0x78] sm:$0xff]  ;;  %450 = vmatprep.subr.mxu0 %v243_v0  ;;  %488 = vmatprep.subr.mxu1 %v243_v0  ;;  %v226_v3 = vld [vmem:[#allocation6 + $0x70] sm:$0xff]  ;;  %s449_s13 = sshll.u32 %s768_s2, 8  ;;  %s205_s22 = scalar_lea.vmem [#allocation8], %s441_s21 }
  0x4d   : > { %451 = vmatpush3.msra.mxu0 %v227_v1  ;;  %504 = vmatpush3.msra.mxu1 %v227_v1  ;;  %v225_v5 = vld [vmem:[#allocation6 + $0x68] sm:$0xff]  ;;  %v240_v6 = vld [vmem:[#allocation6 + $0xe0] sm:$0xff]  ;;  %v239_v8 = vld [vmem:[#allocation6 + $0xd8] sm:$0xff]  ;;  %s347_s23 = sshll.u32 %s205_s22, 4  ;;  %s886_s30 = scalar_lea.hbm %s934_s3, %s449_s13  ;;  %s888_s23 = int_to_ptr.vmem [resolvable:$true] %s347_s23 }
  0x4e   : > { %452 = vmatprep.subr.mxu0 %v242_v2  ;;  %489 = vmatprep.subr.mxu1 %v242_v2  ;;  %v224_v7 = vld [vmem:[#allocation6 + $0x60] sm:$0xff]  ;;  %v223_v9 = vld [vmem:[#allocation6 + $0x58] sm:$0xff]  ;;  %v238_v10 = vld [vmem:[#allocation6 + $0xd0] sm:$0xff]  ;;  %s334_s4 = scalar_lea.sflag [#allocation5], %s863_s18  ;;  %s645_s5 = scalar_lea.vmem %s888_s23, 256 }
  0x4f   : > { %453 = vmatpush3.msra.mxu0 %v226_v3  ;;  %505 = vmatpush3.msra.mxu1 %v226_v3  ;;  %v222_v11 = vld [vmem:[#allocation6 + $0x50] sm:$0xff]  ;;  %v237_v12 = vld [vmem:[#allocation6 + $0xc8] sm:$0xff]  ;;  %v236_v14 = vld [vmem:[#allocation6 + $0xc0] sm:$0xff]  ;;  %p646_p3 = scmp.ne.s32.totalorder %s888_s23, %s645_s5  ;;  %p950_p11 = scmp.ne.s32.totalorder %s944_s7, 0 }
  0x50   : > { %454 = vmatprep.subr.mxu0 %v241_v4  ;;  %490 = vmatprep.subr.mxu1 %v241_v4  ;;  %v221_v13 = vld [vmem:[#allocation6 + $0x48] sm:$0xff]  ;;  %v220_v15 = vld [vmem:[#allocation6 + $0x40] sm:$0xff]  ;;  %v235_v16 = vld [vmem:[#allocation6 + $0xb8] sm:$0xff]  ;;  %s721_s2 = smov [#allocation8]  }
  0x51   : > { %455 = vmatpush3.msra.mxu0 %v225_v5  ;;  %506 = vmatpush3.msra.mxu1 %v225_v5  ;;  %v219_v17 = vld [vmem:[#allocation6 + $0x38] sm:$0xff]  ;;  %v234_v18 = vld [vmem:[#allocation6 + $0xb0] sm:$0xff]  ;;  %v233_v20 = vld [vmem:[#allocation6 + $0xa8] sm:$0xff]  ;;  %v245_v38 = vstv %s244_s19  ;;  %p647_p7 = pnand %p646_p3, %p950_p11  ;;  %s649_s8 = sshll.u32 %s721_s2, 4  ;;  %s650_s8 = int_to_ptr.vmem [resolvable:$false] %s649_s8 }
  0x52   : > { %456 = vmatprep.subr.mxu0 %v240_v6  ;;  %491 = vmatprep.subr.mxu1 %v240_v6  ;;  %v218_v19 = vld [vmem:[#allocation6 + $0x30] sm:$0xff]  ;;  %v217_v21 = vld [vmem:[#allocation6 + $0x28] sm:$0xff]  ;;  %v232_v22 = vld [vmem:[#allocation6 + $0xa0] sm:$0xff]  ;;  %s651_s9 = scalar_lea.vmem %s650_s8, 512  ;;  %p652_p10 = scmp.lt.s32.totalorder %s888_s23, %s650_s8 }
  0x53   : > { %457 = vmatpush3.msra.mxu0 %v224_v7  ;;  %507 = vmatpush3.msra.mxu1 %v224_v7  ;;  %v216_v23 = vld [vmem:[#allocation6 + $0x20] sm:$0xff]  ;;  %v231_v24 = vld [vmem:[#allocation6 + $0x98] sm:$0xff]  ;;  %v230_v26 = vld [vmem:[#allocation6 + $0x90] sm:$0xff]  ;;  %p648_p12 = pneg %p647_p7  ;;  %p653_p2 = scmp.lt.s32.totalorder %s651_s9, %s645_s5 }
  0x54   : > { %458 = vmatprep.subr.mxu0 %v239_v8  ;;  %492 = vmatprep.subr.mxu1 %v239_v8  ;;  %v215_v25 = vld [vmem:[#allocation6 + $0x18] sm:$0xff]  ;;  %v214_v27 = vld [vmem:[#allocation6 + $0x10] sm:$0xff]  ;;  %v229_v28 = vld [vmem:[#allocation6 + $0x88] sm:$0xff] }
  0x55   : > { %459 = vmatpush3.msra.mxu0 %v223_v9  ;;  %508 = vmatpush3.msra.mxu1 %v223_v9  ;;  %v213_v29 = vld [vmem:[#allocation6 + $0x8] sm:$0xff]  ;;  %v228_v30 = vld [vmem:[#allocation6 + $0x80] sm:$0xff]  ;;  %v211_v33 = vld [vmem:[%s867_s28 + $0x18] sm:$0xff]  ;;  %p654_p13 = por %p653_p2, %p652_p10 }
  0x56   : > { %460 = vmatprep.subr.mxu0 %v238_v10  ;;  %493 = vmatprep.subr.mxu1 %v238_v10  ;;  %v212_v31 = vld [vmem:[#allocation6] sm:$0xff]  ;;  %v209_v32 = vld [vmem:[%s867_s28 + $0x8] sm:$0xff]  ;;  %v210_v35 = vld [vmem:[%s867_s28 + $0x10] sm:$0xff] }
  0x57   : > { %461 = vmatpush3.msra.mxu0 %v222_v11  ;;  %509 = vmatpush3.msra.mxu1 %v222_v11  ;;  %v208_v34 = vld [vmem:[%s867_s28] sm:$0xff]  ;;  %p655_p0 = pnand %p654_p13, %p648_p12 }
  0x58   : > { %462 = vmatprep.subr.mxu0 %v237_v12  ;;  %494 = vmatprep.subr.mxu1 %v237_v12 }
  0x59   : > { %463 = vmatpush3.msra.mxu0 %v221_v13  ;;  %510 = vmatpush3.msra.mxu1 %v221_v13 }
  0x5a   : > { %464 = vmatprep.subr.mxu0 %v236_v14  ;;  %495 = vmatprep.subr.mxu1 %v236_v14 }
  0x5b   : > { %465 = vmatpush3.msra.mxu0 %v220_v15  ;;  %511 = vmatpush3.msra.mxu1 %v220_v15 }
  0x5c   : > { %466 = vmatprep.subr.mxu0 %v235_v16  ;;  %496 = vmatprep.subr.mxu1 %v235_v16 }
  0x5d   : > { %467 = vmatpush3.msra.mxu0 %v219_v17  ;;  %512 = vmatpush3.msra.mxu1 %v219_v17 }
  0x5e   : > { %468 = vmatprep.subr.mxu0 %v234_v18  ;;  %497 = vmatprep.subr.mxu1 %v234_v18 }
  0x5f   : > { %469 = vmatpush3.msra.mxu0 %v218_v19  ;;  %513 = vmatpush3.msra.mxu1 %v218_v19 }
  0x60   : > { %470 = vmatprep.subr.mxu0 %v233_v20  ;;  %498 = vmatprep.subr.mxu1 %v233_v20 }
  0x61   : > { %471 = vmatpush3.msra.mxu0 %v217_v21  ;;  %514 = vmatpush3.msra.mxu1 %v217_v21 }
  0x62   : > { %472 = vmatprep.subr.mxu0 %v232_v22  ;;  %499 = vmatprep.subr.mxu1 %v232_v22 }
  0x63   : > { %473 = vmatpush3.msra.mxu0 %v216_v23  ;;  %515 = vmatpush3.msra.mxu1 %v216_v23 }
  0x64   : > { %474 = vmatprep.subr.mxu0 %v231_v24  ;;  %500 = vmatprep.subr.mxu1 %v231_v24 }
  0x65   : > { %475 = vmatpush3.msra.mxu0 %v215_v25  ;;  %516 = vmatpush3.msra.mxu1 %v215_v25 }
  0x66   : > { %476 = vmatprep.subr.mxu0 %v230_v26  ;;  %501 = vmatprep.subr.mxu1 %v230_v26 }
  0x67   : > { %477 = vmatpush3.msra.mxu0 %v214_v27  ;;  %517 = vmatpush3.msra.mxu1 %v214_v27 }
  0x68   : > { %478 = vmatprep.subr.mxu0 %v229_v28  ;;  %502 = vmatprep.subr.mxu1 %v229_v28 }
  0x69   : > { %479 = vmatpush3.msra.mxu0 %v213_v29  ;;  %518 = vmatpush3.msra.mxu1 %v213_v29 }
  0x6a   : > { %480 = vmatprep.subr.mxu0 %v228_v30  ;;  %503 = vmatprep.subr.mxu1 %v228_v30 }
  0x6b   : > { %481 = vmatpush3.msra.mxu0 %v212_v31  ;;  %519 = vmatpush3.msra.mxu1 %v212_v31 }
  0x6c   : > { %310 = vmatprep.mubr.f32.mxu0 %v209_v32  ;;  %315 = vmatprep.mubr.f32.mxu1 %v211_v33 }
  0x6d   : > { %311 = vmatmul.mubr.f32.vlgmr.msra.gmra.mxu0 %v208_v34  ;;  %316 = vmatmul.mubr.f32.vlgmr.msra.gmra.mxu1 %v210_v35 }
 0x12d   : > { %v482_v36 = vpop.f32.mrf.mxu0  ;;  %v485_v37 = vpop.f32.mrf.mxu1 }
 0x12f   : > { %v483_v39 = vpop.f32.mrf.mxu0  ;;  %v486_v40 = vpop.f32.mrf.mxu1 }
 0x130   : > { %v484_v41 = vadd.f32 %v483_v39, %v482_v36  ;;  %v487_v42 = vadd.f32 %v486_v40, %v485_v37 }
 0x132   : > { %v313_v43 = vadd.f32 %v484_v41, %v245_v38  ;;  %v318_v44 = vadd.f32 %v487_v42, %v245_v38 }
 0x134   : > { %v321_v45 = vsub.f32 0.0, %v313_v43  ;;  %v322_v46 = vsub.f32 0.0, %v318_v44 }
 0x136   : > { %v323_v47 = vmul.f32 1.442695, %v321_v45  ;;  %v325_v48 = vmul.f32 1.442695, %v322_v46 }
 0x138   : > { %583 = vpow2.f32 %v323_v47 }
 0x139   : > { %585 = vpow2.f32 %v325_v48 }
 0x145   : > { %v584_v49 = vpop.eup %583 }
 0x146   : > { %v586_v50 = vpop.eup %585  ;;  %v327_v51 = vadd.f32 1.0, %v584_v49 }
 0x147   : > { %v328_v52 = vadd.f32 1.0, %v586_v50 }
 0x148   : > { %587 = vrcp.f32 %v327_v51 }
 0x149   : > { %589 = vrcp.f32 %v328_v52 }
 0x155   : > { %v588_v53 = vpop.eup %587 }
 0x156   : > { %v590_v54 = vpop.eup %589  ;;  %331 = vst [vmem:[%s205_s22] sm:$0xff] %v588_v53 }
 0x157   : > { %332 = vst [vmem:[%s205_s22 + $0x8] sm:$0xff] %v590_v54 }
 0x158   : > { %658 = shalt.err (!%p655_p0)
}
 0x159   : > { %s659_s10 = scalar_lea.hbm %s886_s30, 256  ;;  %s663_s26 = scalar_lea.hbm %s934_s3, 512 }
 0x15a   : > { %p660_p5 = scmp.ne.s32.totalorder %s886_s30, %s659_s10  ;;  %p664_p4 = scmp.lt.s32.totalorder %s886_s30, %s934_s3 }
 0x15b   : > { %p665_p6 = scmp.lt.s32.totalorder %s663_s26, %s659_s10 }
 0x15c   : > { %p661_p9 = pnand %p660_p5, %p950_p11 }
 0x15d   : > { %p666_p8 = por %p665_p6, %p664_p4 }
 0x15e   : > { %p662_p1 = pneg %p661_p9 }
 0x160   : > { %p667_p3 = pnand %p666_p8, %p662_p1 }
 0x162   : > { %670 = shalt.err (!%p667_p3)
}
 0x163   : > { %s722_s19 = smov 128   ;;  %s723_s21 = smov 8  }
 0x164   : > { %526 = dma.vmem_to_hbm [thread:$0]  (%p950_p11), %s888_s23, 256, %s886_s30, %s334_s4, %s722_s19, %s722_s19, %s723_s21  }
 0x165 PF: > { %s362_s13 = sand.u32 1, %s701_s14   ;;  %p951_p7 = scmp.ne.s32.totalorder %s940_s20, 0 }
 0x166   : > { %p952_p12 = scmp.ge.s32.totalorder %s713_s17, 2  ;;  %s363_s22 = scalar_lea.sflag [#allocation5], %s362_s13 }
 0x168   : > { %p537_p10 = pnand %p952_p12, %p951_p7 }
 0x16a   : > { %p538_p2 = pneg %p537_p10 }
 0x16c   : > { %696 = dma.done.wait (%p538_p2), %s363_s22, 256  }
 0x16d   : > { %698 = vsyncadd (%p538_p2), %s363_s22, 4294967040  ;;  %p18_p13 = scmp.ge.s32.totalorder %s801_s25, 4   ;;  %s953_s14 = smov %s705_s15 }
 0x16e   : > { %s954_s15 = smov %s709_s16  ;;  %s955_s16 = smov %s818_s6 }
 0x16f   : > { %s956_s17 = smov %s801_s25  ;;  %20 = sbr.rel (!%p18_p13) target bundleno = 8 (0x8), region = 81 }
 0x174   :  { %368 = vsyncpa [#allocation4], 1 }
 0x175   :  { %370 = vsyncpa [#allocation4 + $0x1], 1 }
 0x176   :  { %371 = vsyncpa [#allocation7], 1 }
 0x177   :  { %372 = vsyncpa [#allocation5], 1 }
 0x178   :  { %374 = vsyncpa [#allocation5 + $0x1], 1 }

</bundles_post_ra>
